<compile_context>
chip_gen: v5e
topology: v5e:2x2
jax: 0.10.0
libtpu: 0.0.40
codegen_flags: <defaults>
</compile_context>

<pallas_src>
import jax
import jax.numpy as jnp
from jax.experimental import pallas as pl
from jax.experimental.pallas import tpu as pltpu


def _round_up(x: int, m: int) -> int:
    return ((x + m - 1) // m) * m


def qnetwork_kernel(x_ref, w1_ref, b1_ref, w2_ref, b2_ref, w3_ref, b3_ref, o_ref):
    # Layer 1: Linear(state_dim -> hidden) + ReLU. bf16 operands on MXU, f32 accumulate.
    h = jnp.dot(x_ref[...], w1_ref[...], preferred_element_type=jnp.float32)
    h = jnp.maximum(h + b1_ref[...], 0.0)  # f32 bias + ReLU on the VPU
    # Layer 2: Linear(hidden -> hidden) + ReLU (num_layers=3 => exactly one hidden layer).
    h = jnp.dot(h.astype(w2_ref.dtype), w2_ref[...], preferred_element_type=jnp.float32)
    h = jnp.maximum(h + b2_ref[...], 0.0)
    # Layer 3: Linear(hidden -> num_actions_padded), no activation. Lane-dense store.
    q = jnp.dot(h.astype(w3_ref.dtype), w3_ref[...], preferred_element_type=jnp.float32)
    o_ref[...] = (q + b3_ref[...]).astype(o_ref.dtype)


def _forward_impl(x, params, *, batch_tile, compute_dtype, single_buffer_weights):
    B, state_dim = x.shape
    hidden = params["w1"].shape[1]
    num_actions = params["w3"].shape[1]

    itemsize = jnp.dtype(compute_dtype).itemsize
    sublane = 8 * (4 // itemsize)  # 8 rows for f32, 16 for bf16 (native packing)

    # Tile sizing: big MXU-friendly tiles; whole (padded) batch in one step when B is small.
    tile = min(batch_tile, _round_up(B, sublane))
    b_pad = _round_up(B, tile)
    out_pad = _round_up(num_actions, 128)  # lane-dense output store

    # Pad + cast at the boundary: bf16 matmul operands, f32 biases.
    x_p = jnp.zeros((b_pad, state_dim), compute_dtype).at[:B].set(x.astype(compute_dtype))
    w1 = params["w1"].astype(compute_dtype)
    w2 = params["w2"].astype(compute_dtype)
    w3 = jnp.zeros((hidden, out_pad), compute_dtype).at[:, :num_actions].set(
        params["w3"].astype(compute_dtype))
    b1 = params["b1"].astype(jnp.float32)
    b2 = params["b2"].astype(jnp.float32)
    b3 = jnp.zeros((1, out_pad), jnp.float32).at[:, :num_actions].set(
        params["b3"].astype(jnp.float32))

    grid = (b_pad // tile,)

    def resident(shape):
        # Constant index map -> block stays resident across all batch tiles (no re-fetch).
        if single_buffer_weights:
            return pl.BlockSpec(shape, lambda i: (0, 0), pipeline_mode=pl.Buffered(1))
        return pl.BlockSpec(shape, lambda i: (0, 0))

    # Explicit VMEM budget: weights (+biases) x buffer count, tiles double-buffered,
    # plus headroom for activations/accumulators. Clamp to v7x's 64 MiB physical VMEM.
    wbuf = 1 if single_buffer_weights else 2
    est_bytes = (
        2 * tile * state_dim * itemsize                                  # x tile (x2 bufs)
        + 2 * tile * out_pad * 4                                         # out tile (x2 bufs)
        + wbuf * (state_dim * hidden + hidden * hidden + hidden * out_pad) * itemsize
        + wbuf * (2 * hidden + out_pad) * 4                              # biases
        + 4 * tile * max(hidden, out_pad) * 4                            # activation headroom
    )
    vmem_limit = int(min(max(2 * est_bytes, 32 * 1024 * 1024), 64 * 1024 * 1024))

    out_padded = pl.pallas_call(
        qnetwork_kernel,
        out_shape=jax.ShapeDtypeStruct((b_pad, out_pad), jnp.float32),
        grid_spec=pltpu.PrefetchScalarGridSpec(
            num_scalar_prefetch=0,
            grid=grid,
            in_specs=[
                pl.BlockSpec((tile, state_dim), lambda i: (i, 0)),  # x tile (streamed)
                resident((state_dim, hidden)),                      # w1
                resident((1, hidden)),                              # b1
                resident((hidden, hidden)),                         # w2
                resident((1, hidden)),                              # b2
                resident((hidden, out_pad)),                        # w3 (lane-padded)
                resident((1, out_pad)),                             # b3 (lane-padded)
            ],
            out_specs=pl.BlockSpec((tile, out_pad), lambda i: (i, 0)),
        ),
        compiler_params=pltpu.CompilerParams(
            dimension_semantics=("parallel",),  # batch axis feeds both TCs on v7x
            vmem_limit_bytes=vmem_limit,
        ),
    )(x_p, w1, b1, w2, b2, w3, b3)

    return out_padded[:B, :num_actions]


def qnetwork_forward(x, params, *, batch_tile=128, compute_dtype=jnp.bfloat16):
    """x: [B, state_dim] float32. params: dict of (in,out) weights and (1,out) biases
    (weights stored transposed vs PyTorch so the kernel computes x @ W + b)."""
    try:
        return _forward_impl(x, params, batch_tile=batch_tile,
                             compute_dtype=compute_dtype, single_buffer_weights=True)
    except Exception:
        # pipeline_mode=pl.Buffered(1) unsupported on this jax version; fall back to the
        # default double-buffered weight blocks (identical math, slightly more VMEM).
        return _forward_impl(x, params, batch_tile=batch_tile,
                             compute_dtype=compute_dtype, single_buffer_weights=False)


def init_params(key, state_dim, hidden_dim, num_actions):
    """Deterministic init mimicking nn.Linear default (uniform +/- 1/sqrt(fan_in))."""
    ks = jax.random.split(key, 6)

    def lin(kw, kb, fan_in, fan_out):
        bound = 1.0 / jnp.sqrt(fan_in)
        w = jax.random.uniform(kw, (fan_in, fan_out), jnp.float32, -bound, bound)
        b = jax.random.uniform(kb, (1, fan_out), jnp.float32, -bound, bound)
        return w, b

    w1, b1 = lin(ks[0], ks[1], state_dim, hidden_dim)
    w2, b2 = lin(ks[2], ks[3], hidden_dim, hidden_dim)
    w3, b3 = lin(ks[4], ks[5], hidden_dim, num_actions)
    return {"w1": w1, "b1": b1, "w2": w2, "b2": b2, "w3": w3, "b3": b3}


def reference_forward(x, p, compute_dtype=jnp.float32):
    """Pure-JAX reference; compute_dtype=bf16 mirrors the kernel's matmul precision."""
    cd = compute_dtype
    h = jnp.dot(x.astype(cd), p["w1"].astype(cd), preferred_element_type=jnp.float32)
    h = jnp.maximum(h + p["b1"], 0.0)
    h = jnp.dot(h.astype(cd), p["w2"].astype(cd), preferred_element_type=jnp.float32)
    h = jnp.maximum(h + p["b2"], 0.0)
    q = jnp.dot(h.astype(cd), p["w3"].astype(cd), preferred_element_type=jnp.float32)
    return q + p["b3"]


if __name__ == "__main__":
    # Small shapes consistent with the module: batch=6 (non-multiple of the tile, to
    # exercise padding), state_dim=16, hidden_dim=32, num_actions=4, num_layers=3.
    B, state_dim, hidden_dim, num_actions = 6, 16, 32, 4

    key = jax.random.PRNGKey(0)
    kx, kp = jax.random.split(key)
    x = jax.random.normal(kx, (B, state_dim), dtype=jnp.float32)
    params = init_params(kp, state_dim, hidden_dim, num_actions)

    out = qnetwork_forward(x, params)
    out = jax.block_until_ready(out)
    assert out.shape == (B, num_actions)

    ref_bf16 = reference_forward(x, params, compute_dtype=jnp.bfloat16)
    ref_f32 = reference_forward(x, params, compute_dtype=jnp.float32)
    assert jnp.allclose(out, ref_bf16, atol=2e-3, rtol=2e-3), "mismatch vs bf16-precision reference"
    assert jnp.allclose(out, ref_f32, atol=3e-2, rtol=3e-2), "mismatch vs f32 reference"

    print("KERNEL_OK")
</pallas_src>

<mosaic_0001>
module attributes {stable_mosaic.version = 11 : i64} {
  func.func @qnetwork_kernel(%arg0: i32, %arg1: memref<16x16xbf16, #tpu.memory_space<vmem>>, %arg2: memref<16x32xbf16, #tpu.memory_space<vmem>>, %arg3: memref<1x32xf32, #tpu.memory_space<vmem>>, %arg4: memref<32x32xbf16, #tpu.memory_space<vmem>>, %arg5: memref<1x32xf32, #tpu.memory_space<vmem>>, %arg6: memref<32x128xbf16, #tpu.memory_space<vmem>>, %arg7: memref<1x128xf32, #tpu.memory_space<vmem>>, %arg8: memref<16x128xf32, #tpu.memory_space<vmem>>) attributes {dimension_semantics = [#tpu.dimension_semantics<parallel>], iteration_bounds = array<i64: 1>, scalar_prefetch = 0 : i64, scratch_operands = 0 : i64, tpu.core_type = #tpu.core_type<tc>, window_params = [{transform_indices = @transform_0, window_bounds = array<i64: 16, 16>}, {pipeline_mode = #tpu.pipeline_mode<synchronous>, transform_indices = @transform_1, window_bounds = array<i64: 16, 32>}, {pipeline_mode = #tpu.pipeline_mode<synchronous>, transform_indices = @transform_2, window_bounds = array<i64: 1, 32>}, {pipeline_mode = #tpu.pipeline_mode<synchronous>, transform_indices = @transform_3, window_bounds = array<i64: 32, 32>}, {pipeline_mode = #tpu.pipeline_mode<synchronous>, transform_indices = @transform_4, window_bounds = array<i64: 1, 32>}, {pipeline_mode = #tpu.pipeline_mode<synchronous>, transform_indices = @transform_5, window_bounds = array<i64: 32, 128>}, {pipeline_mode = #tpu.pipeline_mode<synchronous>, transform_indices = @transform_6, window_bounds = array<i64: 1, 128>}, {transform_indices = @transform_7, window_bounds = array<i64: 16, 128>}]} {
    %c0 = arith.constant 0 : index
    %c0_0 = arith.constant 0 : index
    %0 = vector.load %arg1[%c0, %c0_0] : memref<16x16xbf16, #tpu.memory_space<vmem>>, vector<16x16xbf16>
    %c0_1 = arith.constant 0 : index
    %c0_2 = arith.constant 0 : index
    %1 = vector.load %arg2[%c0_1, %c0_2] : memref<16x32xbf16, #tpu.memory_space<vmem>>, vector<16x32xbf16>
    %cst = arith.constant dense<0.000000e+00> : vector<16x32xf32>
    %2 = tpu.matmul %0, %1, %cst {dimension_numbers = #tpu.dot_dimension_numbers<[1], [0], [0], [1], [0, 0, 1, 1], [], []>} : vector<16x16xbf16>, vector<16x32xbf16>, vector<16x32xf32> -> vector<16x32xf32>
    %c0_3 = arith.constant 0 : index
    %c0_4 = arith.constant 0 : index
    %3 = vector.load %arg3[%c0_3, %c0_4] : memref<1x32xf32, #tpu.memory_space<vmem>>, vector<1x32xf32>
    %4 = vector.broadcast %3 : vector<1x32xf32> to vector<16x32xf32>
    %5 = arith.addf %2, %4 : vector<16x32xf32>
    %cst_5 = arith.constant 0.000000e+00 : f32
    %6 = vector.broadcast %cst_5 : f32 to vector<16x32xf32>
    %7 = arith.maximumf %5, %6 : vector<16x32xf32>
    %8 = arith.truncf %7 : vector<16x32xf32> to vector<16x32xbf16>
    %c0_6 = arith.constant 0 : index
    %c0_7 = arith.constant 0 : index
    %9 = vector.load %arg4[%c0_6, %c0_7] : memref<32x32xbf16, #tpu.memory_space<vmem>>, vector<32x32xbf16>
    %cst_8 = arith.constant dense<0.000000e+00> : vector<16x32xf32>
    %10 = tpu.matmul %8, %9, %cst_8 {dimension_numbers = #tpu.dot_dimension_numbers<[1], [0], [0], [1], [0, 0, 1, 1], [], []>} : vector<16x32xbf16>, vector<32x32xbf16>, vector<16x32xf32> -> vector<16x32xf32>
    %c0_9 = arith.constant 0 : index
    %c0_10 = arith.constant 0 : index
    %11 = vector.load %arg5[%c0_9, %c0_10] : memref<1x32xf32, #tpu.memory_space<vmem>>, vector<1x32xf32>
    %12 = vector.broadcast %11 : vector<1x32xf32> to vector<16x32xf32>
    %13 = arith.addf %10, %12 : vector<16x32xf32>
    %cst_11 = arith.constant 0.000000e+00 : f32
    %14 = vector.broadcast %cst_11 : f32 to vector<16x32xf32>
    %15 = arith.maximumf %13, %14 : vector<16x32xf32>
    %16 = arith.truncf %15 : vector<16x32xf32> to vector<16x32xbf16>
    %c0_12 = arith.constant 0 : index
    %c0_13 = arith.constant 0 : index
    %17 = vector.load %arg6[%c0_12, %c0_13] : memref<32x128xbf16, #tpu.memory_space<vmem>>, vector<32x128xbf16>
    %cst_14 = arith.constant dense<0.000000e+00> : vector<16x128xf32>
    %18 = tpu.matmul %16, %17, %cst_14 {dimension_numbers = #tpu.dot_dimension_numbers<[1], [0], [0], [1], [0, 0, 1, 1], [], []>} : vector<16x32xbf16>, vector<32x128xbf16>, vector<16x128xf32> -> vector<16x128xf32>
    %c0_15 = arith.constant 0 : index
    %c0_16 = arith.constant 0 : index
    %19 = vector.load %arg7[%c0_15, %c0_16] : memref<1x128xf32, #tpu.memory_space<vmem>>, vector<1x128xf32>
    %20 = vector.broadcast %19 : vector<1x128xf32> to vector<16x128xf32>
    %21 = arith.addf %18, %20 : vector<16x128xf32>
    %c0_17 = arith.constant 0 : index
    %c0_18 = arith.constant 0 : index
    %22 = vector.load %arg8[%c0_17, %c0_18] : memref<16x128xf32, #tpu.memory_space<vmem>>, vector<16x128xf32>
    tpu.vector_store %arg8[%c0_17, %c0_18], %21 {strides = array<i32>} : memref<16x128xf32, #tpu.memory_space<vmem>>, vector<16x128xf32>,
    return
  }
  func.func @transform_0(%arg0: i32) -> (i32, i32) {
    %c0_i32 = arith.constant 0 : i32
    %c0_i32_0 = arith.constant 0 : i32
    return %arg0, %c0_i32 : i32, i32
  }
  func.func @transform_1(%arg0: i32) -> (i32, i32) {
    %c0_i32 = arith.constant 0 : i32
    %c0_i32_0 = arith.constant 0 : i32
    %c0_i32_1 = arith.constant 0 : i32
    return %c0_i32, %c0_i32_0 : i32, i32
  }
  func.func @transform_2(%arg0: i32) -> (i32, i32) {
    %c0_i32 = arith.constant 0 : i32
    %c0_i32_0 = arith.constant 0 : i32
    %c0_i32_1 = arith.constant 0 : i32
    return %c0_i32, %c0_i32_0 : i32, i32
  }
  func.func @transform_3(%arg0: i32) -> (i32, i32) {
    %c0_i32 = arith.constant 0 : i32
    %c0_i32_0 = arith.constant 0 : i32
    %c0_i32_1 = arith.constant 0 : i32
    return %c0_i32, %c0_i32_0 : i32, i32
  }
  func.func @transform_4(%arg0: i32) -> (i32, i32) {
    %c0_i32 = arith.constant 0 : i32
    %c0_i32_0 = arith.constant 0 : i32
    %c0_i32_1 = arith.constant 0 : i32
    return %c0_i32, %c0_i32_0 : i32, i32
  }
  func.func @transform_5(%arg0: i32) -> (i32, i32) {
    %c0_i32 = arith.constant 0 : i32
    %c0_i32_0 = arith.constant 0 : i32
    %c0_i32_1 = arith.constant 0 : i32
    return %c0_i32, %c0_i32_0 : i32, i32
  }
  func.func @transform_6(%arg0: i32) -> (i32, i32) {
    %c0_i32 = arith.constant 0 : i32
    %c0_i32_0 = arith.constant 0 : i32
    %c0_i32_1 = arith.constant 0 : i32
    return %c0_i32, %c0_i32_0 : i32, i32
  }
  func.func @transform_7(%arg0: i32) -> (i32, i32) {
    %c0_i32 = arith.constant 0 : i32
    %c0_i32_0 = arith.constant 0 : i32
    return %arg0, %c0_i32 : i32, i32
  }
}

module attributes {stable_mosaic.version = 11 : i64} {
  func.func @qnetwork_kernel(%arg0: i32, %arg1: memref<16x16xbf16, #tpu.memory_space<vmem>>, %arg2: memref<16x32xbf16, #tpu.memory_space<vmem>>, %arg3: memref<1x32xf32, #tpu.memory_space<vmem>>, %arg4: memref<32x32xbf16, #tpu.memory_space<vmem>>, %arg5: memref<1x32xf32, #tpu.memory_space<vmem>>, %arg6: memref<32x128xbf16, #tpu.memory_space<vmem>>, %arg7: memref<1x128xf32, #tpu.memory_space<vmem>>, %arg8: memref<16x128xf32, #tpu.memory_space<vmem>>) attributes {dimension_semantics = [#tpu.dimension_semantics<parallel>], iteration_bounds = array<i64: 1>, scalar_prefetch = 0 : i64, scratch_operands = 0 : i64, tpu.core_type = #tpu.core_type<tc>, window_params = [{transform_indices = @transform_0, window_bounds = array<i64: 16, 16>}, {pipeline_mode = #tpu.pipeline_mode<synchronous>, transform_indices = @transform_1, window_bounds = array<i64: 16, 32>}, {pipeline_mode = #tpu.pipeline_mode<synchronous>, transform_indices = @transform_2, window_bounds = array<i64: 1, 32>}, {pipeline_mode = #tpu.pipeline_mode<synchronous>, transform_indices = @transform_3, window_bounds = array<i64: 32, 32>}, {pipeline_mode = #tpu.pipeline_mode<synchronous>, transform_indices = @transform_4, window_bounds = array<i64: 1, 32>}, {pipeline_mode = #tpu.pipeline_mode<synchronous>, transform_indices = @transform_5, window_bounds = array<i64: 32, 128>}, {pipeline_mode = #tpu.pipeline_mode<synchronous>, transform_indices = @transform_6, window_bounds = array<i64: 1, 128>}, {transform_indices = @transform_7, window_bounds = array<i64: 16, 128>}]} {
    %c0 = arith.constant 0 : index
    %c0_0 = arith.constant 0 : index
    %0 = vector.load %arg1[%c0, %c0_0] : memref<16x16xbf16, #tpu.memory_space<vmem>>, vector<16x16xbf16>
    %c0_1 = arith.constant 0 : index
    %c0_2 = arith.constant 0 : index
    %1 = vector.load %arg2[%c0_1, %c0_2] : memref<16x32xbf16, #tpu.memory_space<vmem>>, vector<16x32xbf16>
    %cst = arith.constant dense<0.000000e+00> : vector<16x32xf32>
    %2 = tpu.matmul %0, %1, %cst {dimension_numbers = #tpu.dot_dimension_numbers<[1], [0], [0], [1], [0, 0, 1, 1], [], []>} : vector<16x16xbf16>, vector<16x32xbf16>, vector<16x32xf32> -> vector<16x32xf32>
    %c0_3 = arith.constant 0 : index
    %c0_4 = arith.constant 0 : index
    %3 = vector.load %arg3[%c0_3, %c0_4] : memref<1x32xf32, #tpu.memory_space<vmem>>, vector<1x32xf32>
    %4 = vector.broadcast %3 : vector<1x32xf32> to vector<16x32xf32>
    %5 = arith.addf %2, %4 : vector<16x32xf32>
    %cst_5 = arith.constant 0.000000e+00 : f32
    %6 = vector.broadcast %cst_5 : f32 to vector<16x32xf32>
    %7 = arith.maximumf %5, %6 : vector<16x32xf32>
    %8 = arith.truncf %7 : vector<16x32xf32> to vector<16x32xbf16>
    %c0_6 = arith.constant 0 : index
    %c0_7 = arith.constant 0 : index
    %9 = vector.load %arg4[%c0_6, %c0_7] : memref<32x32xbf16, #tpu.memory_space<vmem>>, vector<32x32xbf16>
    %cst_8 = arith.constant dense<0.000000e+00> : vector<16x32xf32>
    %10 = tpu.matmul %8, %9, %cst_8 {dimension_numbers = #tpu.dot_dimension_numbers<[1], [0], [0], [1], [0, 0, 1, 1], [], []>} : vector<16x32xbf16>, vector<32x32xbf16>, vector<16x32xf32> -> vector<16x32xf32>
    %c0_9 = arith.constant 0 : index
    %c0_10 = arith.constant 0 : index
    %11 = vector.load %arg5[%c0_9, %c0_10] : memref<1x32xf32, #tpu.memory_space<vmem>>, vector<1x32xf32>
    %12 = vector.broadcast %11 : vector<1x32xf32> to vector<16x32xf32>
    %13 = arith.addf %10, %12 : vector<16x32xf32>
    %cst_11 = arith.constant 0.000000e+00 : f32
    %14 = vector.broadcast %cst_11 : f32 to vector<16x32xf32>
    %15 = arith.maximumf %13, %14 : vector<16x32xf32>
    %16 = arith.truncf %15 : vector<16x32xf32> to vector<16x32xbf16>
    %c0_12 = arith.constant 0 : index
    %c0_13 = arith.constant 0 : index
    %17 = vector.load %arg6[%c0_12, %c0_13] : memref<32x128xbf16, #tpu.memory_space<vmem>>, vector<32x128xbf16>
    %cst_14 = arith.constant dense<0.000000e+00> : vector<16x128xf32>
    %18 = tpu.matmul %16, %17, %cst_14 {dimension_numbers = #tpu.dot_dimension_numbers<[1], [0], [0], [1], [0, 0, 1, 1], [], []>} : vector<16x32xbf16>, vector<32x128xbf16>, vector<16x128xf32> -> vector<16x128xf32>
    %c0_15 = arith.constant 0 : index
    %c0_16 = arith.constant 0 : index
    %19 = vector.load %arg7[%c0_15, %c0_16] : memref<1x128xf32, #tpu.memory_space<vmem>>, vector<1x128xf32>
    %20 = vector.broadcast %19 : vector<1x128xf32> to vector<16x128xf32>
    %21 = arith.addf %18, %20 : vector<16x128xf32>
    %c0_17 = arith.constant 0 : index
    %c0_18 = arith.constant 0 : index
    %22 = vector.load %arg8[%c0_17, %c0_18] : memref<16x128xf32, #tpu.memory_space<vmem>>, vector<16x128xf32>
    tpu.vector_store %arg8[%c0_17, %c0_18], %21 {strides = array<i32>} : memref<16x128xf32, #tpu.memory_space<vmem>>, vector<16x128xf32>,
    return
  }
  func.func @transform_0(%arg0: i32) -> (i32, i32) {
    %c0_i32 = arith.constant 0 : i32
    %c0_i32_0 = arith.constant 0 : i32
    return %arg0, %c0_i32 : i32, i32
  }
  func.func @transform_1(%arg0: i32) -> (i32, i32) {
    %c0_i32 = arith.constant 0 : i32
    %c0_i32_0 = arith.constant 0 : i32
    %c0_i32_1 = arith.constant 0 : i32
    return %c0_i32, %c0_i32_0 : i32, i32
  }
  func.func @transform_2(%arg0: i32) -> (i32, i32) {
    %c0_i32 = arith.constant 0 : i32
    %c0_i32_0 = arith.constant 0 : i32
    %c0_i32_1 = arith.constant 0 : i32
    return %c0_i32, %c0_i32_0 : i32, i32
  }
  func.func @transform_3(%arg0: i32) -> (i32, i32) {
    %c0_i32 = arith.constant 0 : i32
    %c0_i32_0 = arith.constant 0 : i32
    %c0_i32_1 = arith.constant 0 : i32
    return %c0_i32, %c0_i32_0 : i32, i32
  }
  func.func @transform_4(%arg0: i32) -> (i32, i32) {
    %c0_i32 = arith.constant 0 : i32
    %c0_i32_0 = arith.constant 0 : i32
    %c0_i32_1 = arith.constant 0 : i32
    return %c0_i32, %c0_i32_0 : i32, i32
  }
  func.func @transform_5(%arg0: i32) -> (i32, i32) {
    %c0_i32 = arith.constant 0 : i32
    %c0_i32_0 = arith.constant 0 : i32
    %c0_i32_1 = arith.constant 0 : i32
    return %c0_i32, %c0_i32_0 : i32, i32
  }
  func.func @transform_6(%arg0: i32) -> (i32, i32) {
    %c0_i32 = arith.constant 0 : i32
    %c0_i32_0 = arith.constant 0 : i32
    %c0_i32_1 = arith.constant 0 : i32
    return %c0_i32, %c0_i32_0 : i32, i32
  }
  func.func @transform_7(%arg0: i32) -> (i32, i32) {
    %c0_i32 = arith.constant 0 : i32
    %c0_i32_0 = arith.constant 0 : i32
    return %arg0, %c0_i32 : i32, i32
  }
}

</mosaic_0001>

<bundles_post_ra>
// kernel: tpu_custom_call.1
= control target key start
LH: loop header
LB: loop body
LE: loop exit
PB: predicated region body
PF: predicated region fallthrough
CT: control target
= control target key end

     0   :  { %12 = vsyncpa [#allocation3], 0  ;;  %s478_s0 = inlined_call_operand.hbm [shape: bf16[16,16], index: 0, kind: input, shape index: {}]   ;;  %s479_s1 = inlined_call_operand.hbm [shape: bf16[16,32], index: 1, kind: input, shape index: {}]   ;;  %s480_s2 = inlined_call_operand.vmem [shape: f32[1,32], index: 2, kind: input, shape index: {}]   ;;  %s481_s3 = inlined_call_operand.hbm [shape: bf16[32,32], index: 3, kind: input, shape index: {}]   ;;  %s482_s4 = inlined_call_operand.vmem [shape: f32[1,32], index: 4, kind: input, shape index: {}]   ;;  %s483_s5 = inlined_call_operand.hbm [shape: bf16[32,128], index: 5, kind: input, shape index: {}]   ;;  %s484_s6 = inlined_call_operand.vmem [shape: f32[1,128], index: 6, kind: input, shape index: {}]   ;;  %s485_s7 = inlined_call_operand.hbm [shape: f32[16,128], index: 7, kind: output, shape index: {}]  }
   0x1   :  { %13 = vsyncpa [#allocation6], 0 }
   0x2   :  { %14 = vsyncpa [#allocation9], 0 }
   0x3   :  { %15 = vsyncpa [#allocation4], 0  ;;  %s33_s26 = sshll.u32 %s479_s1, 4  ;;  %s405_s27 = smov [#allocation5]   ;;  %s34_s26 = int_to_ptr.hbm [resolvable:$true] %s33_s26 }
   0x4   :  { %s35_s28 = sshll.u32 %s405_s27, 4  ;;  %s20_s8 = sshll.u32 %s478_s0, 4  ;;  %s36_s28 = int_to_ptr.vmem [resolvable:$true] %s35_s28  ;;  %s21_s8 = int_to_ptr.hbm [resolvable:$true] %s20_s8 }
   0x5   :  { %s406_s9 = smov 64   ;;  %s407_s10 = smov 4  }
   0x6   :  { %41 = dma.hbm_to_vmem [thread:$0]  %s34_s26, 128, %s36_s28, [#allocation6], %s406_s9, %s406_s9, %s407_s10  }
   0x7   :  { %s408_s11 = smov [#allocation2]   ;;  %s48_s15 = sshll.u32 %s481_s3, 4  ;;  %s49_s15 = int_to_ptr.hbm [resolvable:$true] %s48_s15 }
   0x8   :  { %s22_s12 = sshll.u32 %s408_s11, 4  ;;  %s63_s17 = sshll.u32 %s483_s5, 4  ;;  %s23_s12 = int_to_ptr.vmem [resolvable:$true] %s22_s12  ;;  %s64_s17 = int_to_ptr.hbm [resolvable:$true] %s63_s17 }
   0x9   :  { %28 = dma.hbm_to_vmem [thread:$0]  %s21_s8, 128, %s23_s12, [#allocation3], %s406_s9, %s406_s9, %s407_s10  }
   0xa   :  { %s409_s18 = smov [#allocation7]   ;;  %s410_s0 = smov [#allocation8]  }
   0xb   :  { %s50_s19 = sshll.u32 %s409_s18, 4  ;;  %s65_s20 = sshll.u32 %s410_s0, 4  ;;  %s51_s19 = int_to_ptr.vmem [resolvable:$true] %s50_s19  ;;  %s66_s20 = int_to_ptr.vmem [resolvable:$true] %s65_s20 }
   0xc   :  { %56 = dma.hbm_to_vmem [thread:$0]  %s49_s15, 256, %s51_s19, [#allocation6], %s406_s9, %s406_s9, %s407_s10  }
   0xd   :  { %71 = dma.hbm_to_vmem [thread:$0]  %s64_s17, 256, %s66_s20, [#allocation9], %s406_s9, %s406_s9, %s407_s10  }
   0xe   :  { %397 = dma.done.wait [#allocation3], 128  }
   0xf   :  { %398 = vsyncadd [#allocation3], 4294967168 }
  0x10   :  { %399 = dma.done.wait [#allocation6], 384  }
  0x11   :  { %400 = vsyncadd [#allocation6], 4294966912 }
  0x12   :  { %401 = dma.done.wait [#allocation9], 256  }
  0x13   :  { %402 = vsyncadd [#allocation9], 4294967040  ;;  %v260_v0 = vld [vmem:[#allocation5] sm:$0xff]  ;;  %v259_v1 = vld [vmem:[#allocation2] sm:$0xff]  ;;  %vm110_vm0 = vcmask 130048   ;;  %vm151_vm1 = vcmask 261120  }
  0x14   :  { %121 = vmatpush.bf16.msra.mxu0 %v260_v0  ;;  %v262_v2 = vld [vmem:[#allocation7 + $0x8] sm:$0xff]  ;;  %v261_v3 = vld [vmem:[#allocation7] sm:$0xff]  ;;  %v274_v5 = vld [vmem:[%s480_s2] ss:$0 sm:$0xff]  ;;  %s411_s24 = smov [#allocation10]   ;;  %s412_s28 = smov 128  }
  0x15   :  { %161 = vmatpush.bf16.msra.mxu1 %v262_v2  ;;  %v264_v12 = vld [vmem:[#allocation8 + $0x8] sm:$0xff]  ;;  %v263_v13 = vld [vmem:[#allocation8] sm:$0xff]  ;;  %s215_s25 = sshll.u32 %s411_s24, 4  ;;  %s413_s29 = smov 8   ;;  %s216_s25 = int_to_ptr.vmem [resolvable:$true] %s215_s25 }
  0x16   :  { %201 = vmatpush.bf16.msra.mxu2 %v264_v12  ;;  %v275_v15 = vld [vmem:[%s482_s4] ss:$0 sm:$0xff]  ;;  %s217_s4 = sshll.u32 %s485_s7, 4  ;;  %s218_s4 = int_to_ptr.hbm [resolvable:$true] %s217_s4 }
  0x17   :  { %240 = vmatmul.msk.bf16.vlgmr.msra.gmra.mxu0 %vm110_vm0, %v259_v1  ;;  %v276_v22 = vld [vmem:[%s484_s6] ss:$0 sm:$0xff] }
  0x19   :  { %162 = vmatpush.bf16.msra.mxu1 %v261_v3 }
  0x1a   :  { %202 = vmatpush.bf16.msra.mxu2 %v263_v13 }
  0x94   :  { %v123_v4 = vpop.f32.mrf.mxu0 }
  0x95   :  { %v124_v6 = vadd.f32 %v274_v5, %v123_v4 }
  0x97   :  { %v128_v9 = vmax.f32 %v124_v6, 0.0 }
  0x9c   :  { %v125_v7 = vpop.f32.mrf.mxu0 }
  0x9d   :  { %v126_v8 = vadd.f32 %v274_v5, %v125_v7 }
  0x9f   :  { %v129_v10 = vmax.f32 %v126_v8, 0.0 }
  0xa1   :  { %v130_v11 = vpack.c.bf16 %v129_v10, %v128_v9 }
  0xa3   :  { %249 = vmatmul.msk.bf16.vlgmr.msra.gmra.mxu1 %vm151_vm1, %v130_v11 }
 0x120   :  { %v164_v14 = vpop.f32.mrf.mxu1 }
 0x121   :  { %v165_v16 = vadd.f32 %v275_v15, %v164_v14 }
 0x123   :  { %v169_v19 = vmax.f32 %v165_v16, 0.0 }
 0x128   :  { %v166_v17 = vpop.f32.mrf.mxu1 }
 0x129   :  { %v167_v18 = vadd.f32 %v275_v15, %v166_v17 }
 0x12b   :  { %v170_v20 = vmax.f32 %v167_v18, 0.0 }
 0x12d   :  { %v171_v21 = vpack.c.bf16 %v170_v20, %v169_v19 }
 0x12f   :  { %258 = vmatmul.msk.bf16.vlgmr.msra.gmra.mxu2 %vm151_vm1, %v171_v21 }
 0x1b2   :  { %v204_v23 = vpop.f32.mrf.mxu2 }
 0x1b3   :  { %v205_v24 = vadd.f32 %v276_v22, %v204_v23 }
 0x1b5   :  { %209 = vst [vmem:[#allocation10] sm:$0xff] %v205_v24 }
 0x1ba   :  { %v206_v25 = vpop.f32.mrf.mxu2 }
 0x1bb   :  { %v207_v26 = vadd.f32 %v276_v22, %v206_v25 }
 0x1bd   :  { %210 = vst [vmem:[#allocation10 + $0x8] sm:$0xff] %v207_v26 }
 0x1be   :  { %223 = dma.vmem_to_hbm [thread:$0]  %s216_s25, 256, %s218_s4, [#allocation4], %s412_s28, %s412_s28, %s413_s29  }
 0x1bf   :  { %403 = dma.done.wait [#allocation4], 256  }
 0x1c0   :  { %404 = vsyncadd [#allocation4], 4294967040 }
 0x1c1   :  { %228 = vsyncpa [#allocation3], 1 }
 0x1c2   :  { %229 = vsyncpa [#allocation6], 1 }
 0x1c3   :  { %230 = vsyncpa [#allocation9], 1 }
 0x1c4   :  { %231 = vsyncpa [#allocation4], 1 }

// kernel: tpu_custom_call.1
= control target key start
LH: loop header
LB: loop body
LE: loop exit
PB: predicated region body
PF: predicated region fallthrough
CT: control target
= control target key end

     0   :  { %12 = vsyncpa [#allocation3], 0  ;;  %s478_s0 = inlined_call_operand.hbm [shape: bf16[16,16], index: 0, kind: input, shape index: {}]   ;;  %s479_s1 = inlined_call_operand.hbm [shape: bf16[16,32], index: 1, kind: input, shape index: {}]   ;;  %s480_s2 = inlined_call_operand.vmem [shape: f32[1,32], index: 2, kind: input, shape index: {}]   ;;  %s481_s3 = inlined_call_operand.hbm [shape: bf16[32,32], index: 3, kind: input, shape index: {}]   ;;  %s482_s4 = inlined_call_operand.vmem [shape: f32[1,32], index: 4, kind: input, shape index: {}]   ;;  %s483_s5 = inlined_call_operand.hbm [shape: bf16[32,128], index: 5, kind: input, shape index: {}]   ;;  %s484_s6 = inlined_call_operand.vmem [shape: f32[1,128], index: 6, kind: input, shape index: {}]   ;;  %s485_s7 = inlined_call_operand.hbm [shape: f32[16,128], index: 7, kind: output, shape index: {}]  }
   0x1   :  { %13 = vsyncpa [#allocation6], 0 }
   0x2   :  { %14 = vsyncpa [#allocation9], 0 }
   0x3   :  { %15 = vsyncpa [#allocation4], 0  ;;  %s33_s26 = sshll.u32 %s479_s1, 4  ;;  %s405_s27 = smov [#allocation5]   ;;  %s34_s26 = int_to_ptr.hbm [resolvable:$true] %s33_s26 }
   0x4   :  { %s35_s28 = sshll.u32 %s405_s27, 4  ;;  %s20_s8 = sshll.u32 %s478_s0, 4  ;;  %s36_s28 = int_to_ptr.vmem [resolvable:$true] %s35_s28  ;;  %s21_s8 = int_to_ptr.hbm [resolvable:$true] %s20_s8 }
   0x5   :  { %s406_s9 = smov 64   ;;  %s407_s10 = smov 4  }
   0x6   :  { %41 = dma.hbm_to_vmem [thread:$0]  %s34_s26, 128, %s36_s28, [#allocation6], %s406_s9, %s406_s9, %s407_s10  }
   0x7   :  { %s408_s11 = smov [#allocation2]   ;;  %s48_s15 = sshll.u32 %s481_s3, 4  ;;  %s49_s15 = int_to_ptr.hbm [resolvable:$true] %s48_s15 }
   0x8   :  { %s22_s12 = sshll.u32 %s408_s11, 4  ;;  %s63_s17 = sshll.u32 %s483_s5, 4  ;;  %s23_s12 = int_to_ptr.vmem [resolvable:$true] %s22_s12  ;;  %s64_s17 = int_to_ptr.hbm [resolvable:$true] %s63_s17 }
   0x9   :  { %28 = dma.hbm_to_vmem [thread:$0]  %s21_s8, 128, %s23_s12, [#allocation3], %s406_s9, %s406_s9, %s407_s10  }
   0xa   :  { %s409_s18 = smov [#allocation7]   ;;  %s410_s0 = smov [#allocation8]  }
   0xb   :  { %s50_s19 = sshll.u32 %s409_s18, 4  ;;  %s65_s20 = sshll.u32 %s410_s0, 4  ;;  %s51_s19 = int_to_ptr.vmem [resolvable:$true] %s50_s19  ;;  %s66_s20 = int_to_ptr.vmem [resolvable:$true] %s65_s20 }
   0xc   :  { %56 = dma.hbm_to_vmem [thread:$0]  %s49_s15, 256, %s51_s19, [#allocation6], %s406_s9, %s406_s9, %s407_s10  }
   0xd   :  { %71 = dma.hbm_to_vmem [thread:$0]  %s64_s17, 256, %s66_s20, [#allocation9], %s406_s9, %s406_s9, %s407_s10  }
   0xe   :  { %397 = dma.done.wait [#allocation3], 128  }
   0xf   :  { %398 = vsyncadd [#allocation3], 4294967168 }
  0x10   :  { %399 = dma.done.wait [#allocation6], 384  }
  0x11   :  { %400 = vsyncadd [#allocation6], 4294966912 }
  0x12   :  { %401 = dma.done.wait [#allocation9], 256  }
  0x13   :  { %402 = vsyncadd [#allocation9], 4294967040  ;;  %v260_v0 = vld [vmem:[#allocation5] sm:$0xff]  ;;  %v259_v1 = vld [vmem:[#allocation2] sm:$0xff]  ;;  %vm110_vm0 = vcmask 130048   ;;  %vm151_vm1 = vcmask 261120  }
  0x14   :  { %121 = vmatpush.bf16.msra.mxu0 %v260_v0  ;;  %v262_v2 = vld [vmem:[#allocation7 + $0x8] sm:$0xff]  ;;  %v261_v3 = vld [vmem:[#allocation7] sm:$0xff]  ;;  %v274_v5 = vld [vmem:[%s480_s2] ss:$0 sm:$0xff]  ;;  %s411_s24 = smov [#allocation10]   ;;  %s412_s28 = smov 128  }
  0x15   :  { %161 = vmatpush.bf16.msra.mxu1 %v262_v2  ;;  %v264_v12 = vld [vmem:[#allocation8 + $0x8] sm:$0xff]  ;;  %v263_v13 = vld [vmem:[#allocation8] sm:$0xff]  ;;  %s215_s25 = sshll.u32 %s411_s24, 4  ;;  %s413_s29 = smov 8   ;;  %s216_s25 = int_to_ptr.vmem [resolvable:$true] %s215_s25 }
  0x16   :  { %201 = vmatpush.bf16.msra.mxu2 %v264_v12  ;;  %v275_v15 = vld [vmem:[%s482_s4] ss:$0 sm:$0xff]  ;;  %s217_s4 = sshll.u32 %s485_s7, 4  ;;  %s218_s4 = int_to_ptr.hbm [resolvable:$true] %s217_s4 }
  0x17   :  { %240 = vmatmul.msk.bf16.vlgmr.msra.gmra.mxu0 %vm110_vm0, %v259_v1  ;;  %v276_v22 = vld [vmem:[%s484_s6] ss:$0 sm:$0xff] }
  0x19   :  { %162 = vmatpush.bf16.msra.mxu1 %v261_v3 }
  0x1a   :  { %202 = vmatpush.bf16.msra.mxu2 %v263_v13 }
  0x94   :  { %v123_v4 = vpop.f32.mrf.mxu0 }
  0x95   :  { %v124_v6 = vadd.f32 %v274_v5, %v123_v4 }
  0x97   :  { %v128_v9 = vmax.f32 %v124_v6, 0.0 }
  0x9c   :  { %v125_v7 = vpop.f32.mrf.mxu0 }
  0x9d   :  { %v126_v8 = vadd.f32 %v274_v5, %v125_v7 }
  0x9f   :  { %v129_v10 = vmax.f32 %v126_v8, 0.0 }
  0xa1   :  { %v130_v11 = vpack.c.bf16 %v129_v10, %v128_v9 }
  0xa3   :  { %249 = vmatmul.msk.bf16.vlgmr.msra.gmra.mxu1 %vm151_vm1, %v130_v11 }
 0x120   :  { %v164_v14 = vpop.f32.mrf.mxu1 }
 0x121   :  { %v165_v16 = vadd.f32 %v275_v15, %v164_v14 }
 0x123   :  { %v169_v19 = vmax.f32 %v165_v16, 0.0 }
 0x128   :  { %v166_v17 = vpop.f32.mrf.mxu1 }
 0x129   :  { %v167_v18 = vadd.f32 %v275_v15, %v166_v17 }
 0x12b   :  { %v170_v20 = vmax.f32 %v167_v18, 0.0 }
 0x12d   :  { %v171_v21 = vpack.c.bf16 %v170_v20, %v169_v19 }
 0x12f   :  { %258 = vmatmul.msk.bf16.vlgmr.msra.gmra.mxu2 %vm151_vm1, %v171_v21 }
 0x1b2   :  { %v204_v23 = vpop.f32.mrf.mxu2 }
 0x1b3   :  { %v205_v24 = vadd.f32 %v276_v22, %v204_v23 }
 0x1b5   :  { %209 = vst [vmem:[#allocation10] sm:$0xff] %v205_v24 }
 0x1ba   :  { %v206_v25 = vpop.f32.mrf.mxu2 }
 0x1bb   :  { %v207_v26 = vadd.f32 %v276_v22, %v206_v25 }
 0x1bd   :  { %210 = vst [vmem:[#allocation10 + $0x8] sm:$0xff] %v207_v26 }
 0x1be   :  { %223 = dma.vmem_to_hbm [thread:$0]  %s216_s25, 256, %s218_s4, [#allocation4], %s412_s28, %s412_s28, %s413_s29  }
 0x1bf   :  { %403 = dma.done.wait [#allocation4], 256  }
 0x1c0   :  { %404 = vsyncadd [#allocation4], 4294967040 }
 0x1c1   :  { %228 = vsyncpa [#allocation3], 1 }
 0x1c2   :  { %229 = vsyncpa [#allocation6], 1 }
 0x1c3   :  { %230 = vsyncpa [#allocation9], 1 }
 0x1c4   :  { %231 = vsyncpa [#allocation4], 1 }

</bundles_post_ra>
